<compile_context>
chip_gen: v6e
topology: v6e:2x2x1
jax: 0.10.0
libtpu: 0.0.40
codegen_flags: <defaults>
</compile_context>

<pallas_src>
import functools

import jax
import jax.numpy as jnp
from jax.experimental import pallas as pl
from jax.experimental.pallas import tpu as pltpu


def _round_up(x, m):
    return ((x + m - 1) // m) * m


def _yolo_decode_kernel(x_ref, gxy_ref, rowsel_ref, mul_ref, o_ref, *, new_coords):
    """Decode one (spatial-tile, batch) block.

    x_ref / o_ref : VMEM (1, na, no, s_tile)   raw head activations / decoded
    gxy_ref       : VMEM (2, s_tile)           cell-grid xv (row 0), yv (row 1)
    rowsel_ref    : VMEM (3, no, 1)            f32 row masks: is_x, is_y, is_wh
    mul_ref       : VMEM (na, no, 1)           stride / anchor-wh / 1 per row
    """
    x = x_ref[...].astype(jnp.float32)          # upcast right after load (v5e)
    gxy = gxy_ref[...]                          # (2, s_tile)
    sel = rowsel_ref[...]                       # (3, no, 1)
    mul = mul_ref[...]                          # (na, no, 1)

    is_x, is_y = sel[0], sel[1]                 # (no, 1) f32 masks
    is_wh = sel[2] != 0.0                       # (no, 1) bool

    # Grid offsets: xv on row 0, yv on row 1, zero elsewhere.   -> (no, s_tile)
    add = is_x * gxy[0:1, :] + is_y * gxy[1:2, :]

    if new_coords:
        # rows 0/1: (x + grid) * stride ; rows 2/3: x^2 * (4*anchor) ; rest: x
        out = jnp.where(is_wh, x * x, x + add) * mul
    else:
        # rows 2/3: exp(x) * anchor ; others: sigmoid(x) = 1/(1+exp(-x)) (+grid)*stride
        e = jnp.exp(jnp.where(is_wh, x, -x))
        out = jnp.where(is_wh, e, 1.0 / (1.0 + e) + add) * mul

    o_ref[...] = out.astype(o_ref.dtype)


def yolo_layer_forward(x, anchors, img_size, num_classes, new_coords=False):
    """Eval-mode YOLOLayer.forward.  x: NCHW (bs, na*(num_classes+5), ny, nx)."""
    bs, C, ny, nx = x.shape
    no = num_classes + 5
    na = anchors.shape[0]
    assert C == na * no, (C, na, no)
    stride = img_size // ny
    S = ny * nx
    anchors = anchors.astype(jnp.float32)

    # --- spatial tiling: lane dim multiple of 128, <= ~2 MiB of x per block.
    s128 = _round_up(S, 128)
    cap = max(128, ((2 * 1024 * 1024) // (na * no * 4)) // 128 * 128)
    s_tile = min(s128, cap)
    n_s = pl.cdiv(S, s_tile)
    if bs == 1 and n_s == 1 and S > 128:
        # Keep >=2 parallel grid steps so both v7x TensorCores are used.
        s_tile = max(128, _round_up(pl.cdiv(S, 2), 128))
        n_s = pl.cdiv(S, s_tile)

    x5 = x.reshape(bs, na, no, S)               # pure reshape, no cast, no pad

    # --- tiny precomputed operands (resident; fetched at most once per tile) --
    idx = jnp.arange(S, dtype=jnp.int32)
    gxy = jnp.stack([(idx % nx).astype(jnp.float32),
                     (idx // nx).astype(jnp.float32)])            # (2, S)

    rowsel = jnp.zeros((3, no, 1), jnp.float32)
    rowsel = rowsel.at[0, 0, 0].set(1.0)                          # is_x  (row 0)
    rowsel = rowsel.at[1, 1, 0].set(1.0)                          # is_y  (row 1)
    rowsel = rowsel.at[2, 2, 0].set(1.0).at[2, 3, 0].set(1.0)     # is_wh (rows 2,3)

    mul = jnp.ones((na, no), jnp.float32)
    mul = mul.at[:, 0].set(float(stride)).at[:, 1].set(float(stride))
    wh_scale = 4.0 if new_coords else 1.0
    mul = mul.at[:, 2].set(wh_scale * anchors[:, 0])
    mul = mul.at[:, 3].set(wh_scale * anchors[:, 1])
    mul = mul.reshape(na, no, 1)

    kern = functools.partial(_yolo_decode_kernel, new_coords=new_coords)

    out = pl.pallas_call(
        kern,
        out_shape=jax.ShapeDtypeStruct((bs, na, no, S), x.dtype),
        grid=(n_s, bs),                         # batch innermost -> gxy resident
        in_specs=[
            pl.BlockSpec((1, na, no, s_tile), lambda s, b: (b, 0, 0, s)),  # x
            pl.BlockSpec((2, s_tile), lambda s, b: (0, s)),                # gxy
            pl.BlockSpec((3, no, 1), lambda s, b: (0, 0, 0)),              # rowsel
            pl.BlockSpec((na, no, 1), lambda s, b: (0, 0, 0)),             # mul
        ],
        out_specs=pl.BlockSpec((1, na, no, s_tile), lambda s, b: (b, 0, 0, s)),
        compiler_params=pltpu.CompilerParams(
            dimension_semantics=("parallel", "parallel")),
    )(x5, gxy, rowsel, mul)

    # Module contract: (bs, na, ny, nx, no) plus (bs, -1, no) flatten.
    x_out = out.reshape(bs, na, no, ny, nx).transpose(0, 1, 3, 4, 2)
    return x_out.reshape(bs, -1, no), x_out


def yolo_layer_ref(x, anchors, img_size, num_classes, new_coords=False):
    """Pure-JAX reference matching the PyTorch eval-mode forward."""
    bs, C, ny, nx = x.shape
    no = num_classes + 5
    na = anchors.shape[0]
    stride = img_size // ny
    xr = x.reshape(bs, na, no, ny, nx).transpose(0, 1, 3, 4, 2)  # (bs,na,ny,nx,no)
    yv, xv = jnp.meshgrid(jnp.arange(ny), jnp.arange(nx), indexing="ij")
    grid = jnp.stack((xv, yv), 2).reshape(1, 1, ny, nx, 2).astype(jnp.float32)
    anchor_grid = anchors.reshape(1, na, 1, 1, 2).astype(jnp.float32)
    if new_coords:
        xy = (xr[..., 0:2] + grid) * stride
        wh = xr[..., 2:4] ** 2 * (4 * anchor_grid)
        rest = xr[..., 4:]
    else:
        xy = (jax.nn.sigmoid(xr[..., 0:2]) + grid) * stride
        wh = jnp.exp(xr[..., 2:4]) * anchor_grid
        rest = jax.nn.sigmoid(xr[..., 4:])
    out = jnp.concatenate([xy, wh, rest], axis=-1)
    return out.reshape(bs, -1, no), out


if __name__ == "__main__":
    # Deterministic synthetic setup (small shapes).
    # TODO(synk): training-mode branch (reshape/permute only, no math) is plain
    # JAX glue and not given its own kernel.
    num_classes = 3                      # no = 8
    anchors = jnp.array([[10.0, 13.0], [16.0, 30.0], [33.0, 23.0]],
                        dtype=jnp.float32)   # num_anchors = 3
    bs, ny, nx = 2, 16, 16
    img_size = 64                        # stride = 4
    C = anchors.shape[0] * (num_classes + 5)   # 24

    key = jax.random.PRNGKey(0)
    x = jax.random.normal(key, (bs, C, ny, nx), dtype=jnp.float32)

    ok = True
    for nc in (False, True):
        flat, full = yolo_layer_forward(x, anchors, img_size, num_classes,
                                        new_coords=nc)
        jax.block_until_ready((flat, full))
        flat_ref, full_ref = yolo_layer_ref(x, anchors, img_size, num_classes,
                                            new_coords=nc)
        assert flat.shape == (bs, anchors.shape[0] * ny * nx, num_classes + 5)
        assert full.shape == (bs, anchors.shape[0], ny, nx, num_classes + 5)
        ok &= bool(jnp.allclose(full, full_ref, atol=1e-5, rtol=1e-5))
        ok &= bool(jnp.allclose(flat, flat_ref, atol=1e-5, rtol=1e-5))

    assert ok
    print("KERNEL_OK")
</pallas_src>

<mosaic_0001>
module attributes {stable_mosaic.version = 11 : i64} {
  func.func @_yolo_decode_kernel(%arg0: i32, %arg1: i32, %arg2: memref<1x3x8x256xf32, #tpu.memory_space<vmem>>, %arg3: memref<2x256xf32, #tpu.memory_space<vmem>>, %arg4: memref<3x8x1xf32, #tpu.memory_space<vmem>>, %arg5: memref<3x8x1xf32, #tpu.memory_space<vmem>>, %arg6: memref<1x3x8x256xf32, #tpu.memory_space<vmem>>) attributes {dimension_semantics = [#tpu.dimension_semantics<parallel>, #tpu.dimension_semantics<parallel>], iteration_bounds = array<i64: 1, 2>, scalar_prefetch = 0 : i64, scratch_operands = 0 : i64, tpu.core_type = #tpu.core_type<tc>, window_params = [{transform_indices = @transform_0, window_bounds = array<i64: 1, 3, 8, 256>}, {transform_indices = @transform_1, window_bounds = array<i64: 2, 256>}, {pipeline_mode = #tpu.pipeline_mode<synchronous>, transform_indices = @transform_2, window_bounds = array<i64: 3, 8, 1>}, {pipeline_mode = #tpu.pipeline_mode<synchronous>, transform_indices = @transform_3, window_bounds = array<i64: 3, 8, 1>}, {transform_indices = @transform_4, window_bounds = array<i64: 1, 3, 8, 256>}]} {
    %c0 = arith.constant 0 : index
    %c0_0 = arith.constant 0 : index
    %c0_1 = arith.constant 0 : index
    %c0_2 = arith.constant 0 : index
    %0 = vector.load %arg2[%c0, %c0_0, %c0_1, %c0_2] : memref<1x3x8x256xf32, #tpu.memory_space<vmem>>, vector<1x3x8x256xf32>
    %c0_3 = arith.constant 0 : index
    %c0_4 = arith.constant 0 : index
    %1 = vector.load %arg3[%c0_3, %c0_4] : memref<2x256xf32, #tpu.memory_space<vmem>>, vector<2x256xf32>
    %c0_5 = arith.constant 0 : index
    %c0_6 = arith.constant 0 : index
    %c0_7 = arith.constant 0 : index
    %2 = vector.load %arg4[%c0_5, %c0_6, %c0_7] : memref<3x8x1xf32, #tpu.memory_space<vmem>>, vector<3x8x1xf32>
    %c0_8 = arith.constant 0 : index
    %c0_9 = arith.constant 0 : index
    %c0_10 = arith.constant 0 : index
    %3 = vector.load %arg5[%c0_8, %c0_9, %c0_10] : memref<3x8x1xf32, #tpu.memory_space<vmem>>, vector<3x8x1xf32>
    %4 = vector.extract_strided_slice %2 {offsets = [0, 0, 0], sizes = [1, 8, 1], strides = [1, 1, 1]} : vector<3x8x1xf32> to vector<1x8x1xf32>
    %5 = vector.shape_cast %4 : vector<1x8x1xf32> to vector<8x1xf32>
    %6 = vector.extract_strided_slice %2 {offsets = [1, 0, 0], sizes = [1, 8, 1], strides = [1, 1, 1]} : vector<3x8x1xf32> to vector<1x8x1xf32>
    %7 = vector.shape_cast %6 : vector<1x8x1xf32> to vector<8x1xf32>
    %8 = vector.extract_strided_slice %2 {offsets = [2, 0, 0], sizes = [1, 8, 1], strides = [1, 1, 1]} : vector<3x8x1xf32> to vector<1x8x1xf32>
    %9 = vector.shape_cast %8 : vector<1x8x1xf32> to vector<8x1xf32>
    %cst = arith.constant 0.000000e+00 : f32
    %10 = vector.broadcast %cst : f32 to vector<8x1xf32>
    %11 = arith.cmpf one, %9, %10 : vector<8x1xf32>
    %12 = vector.extract_strided_slice %1 {offsets = [0, 0], sizes = [1, 256], strides = [1, 1]} : vector<2x256xf32> to vector<1x256xf32>
    %13 = vector.broadcast %5 : vector<8x1xf32> to vector<8x256xf32>
    %14 = vector.broadcast %12 : vector<1x256xf32> to vector<8x256xf32>
    %15 = arith.mulf %13, %14 : vector<8x256xf32>
    %16 = vector.extract_strided_slice %1 {offsets = [1, 0], sizes = [1, 256], strides = [1, 1]} : vector<2x256xf32> to vector<1x256xf32>
    %17 = vector.broadcast %7 : vector<8x1xf32> to vector<8x256xf32>
    %18 = vector.broadcast %16 : vector<1x256xf32> to vector<8x256xf32>
    %19 = arith.mulf %17, %18 : vector<8x256xf32>
    %20 = arith.addf %15, %19 : vector<8x256xf32>
    %cst_11 = arith.constant 0.000000e+00 : f32
    %21 = vector.broadcast %cst_11 : f32 to vector<1x3x8x256xf32>
    %22 = arith.subf %21, %0 : vector<1x3x8x256xf32>
    %23 = vector.shape_cast %11 : vector<8x1xi1> to vector<1x1x8x1xi1>
    %24 = vector.broadcast %23 : vector<1x1x8x1xi1> to vector<1x3x8x256xi1>
    %25 = arith.select %24, %0, %22 : vector<1x3x8x256xi1>, vector<1x3x8x256xf32>
    %26 = math.exp %25 : vector<1x3x8x256xf32>
    %cst_12 = arith.constant 1.000000e+00 : f32
    %27 = vector.broadcast %cst_12 : f32 to vector<1x3x8x256xf32>
    %28 = arith.addf %27, %26 : vector<1x3x8x256xf32>
    %cst_13 = arith.constant 1.000000e+00 : f32
    %29 = vector.broadcast %cst_13 : f32 to vector<1x3x8x256xf32>
    %30 = arith.divf %29, %28 : vector<1x3x8x256xf32>
    %31 = vector.shape_cast %20 : vector<8x256xf32> to vector<1x1x8x256xf32>
    %32 = vector.broadcast %31 : vector<1x1x8x256xf32> to vector<1x3x8x256xf32>
    %33 = arith.addf %30, %32 : vector<1x3x8x256xf32>
    %34 = vector.shape_cast %11 : vector<8x1xi1> to vector<1x1x8x1xi1>
    %35 = vector.broadcast %34 : vector<1x1x8x1xi1> to vector<1x3x8x256xi1>
    %36 = arith.select %35, %26, %33 : vector<1x3x8x256xi1>, vector<1x3x8x256xf32>
    %37 = vector.shape_cast %3 : vector<3x8x1xf32> to vector<1x3x8x1xf32>
    %38 = vector.broadcast %37 : vector<1x3x8x1xf32> to vector<1x3x8x256xf32>
    %39 = arith.mulf %36, %38 : vector<1x3x8x256xf32>
    %c0_14 = arith.constant 0 : index
    %c0_15 = arith.constant 0 : index
    %c0_16 = arith.constant 0 : index
    %c0_17 = arith.constant 0 : index
    %40 = vector.load %arg6[%c0_14, %c0_15, %c0_16, %c0_17] : memref<1x3x8x256xf32, #tpu.memory_space<vmem>>, vector<1x3x8x256xf32>
    tpu.vector_store %arg6[%c0_14, %c0_15, %c0_16, %c0_17], %39 {strides = array<i32>} : memref<1x3x8x256xf32, #tpu.memory_space<vmem>>, vector<1x3x8x256xf32>,
    return
  }
  func.func @transform_0(%arg0: i32, %arg1: i32) -> (i32, i32, i32, i32) {
    %c0_i32 = arith.constant 0 : i32
    %c0_i32_0 = arith.constant 0 : i32
    %c0_i32_1 = arith.constant 0 : i32
    return %arg1, %c0_i32, %c0_i32_0, %arg0 : i32, i32, i32, i32
  }
  func.func @transform_1(%arg0: i32, %arg1: i32) -> (i32, i32) {
    %c0_i32 = arith.constant 0 : i32
    %c0_i32_0 = arith.constant 0 : i32
    return %c0_i32, %arg0 : i32, i32
  }
  func.func @transform_2(%arg0: i32, %arg1: i32) -> (i32, i32, i32) {
    %c0_i32 = arith.constant 0 : i32
    %c0_i32_0 = arith.constant 0 : i32
    %c0_i32_1 = arith.constant 0 : i32
    %c0_i32_2 = arith.constant 0 : i32
    return %c0_i32, %c0_i32_0, %c0_i32_1 : i32, i32, i32
  }
  func.func @transform_3(%arg0: i32, %arg1: i32) -> (i32, i32, i32) {
    %c0_i32 = arith.constant 0 : i32
    %c0_i32_0 = arith.constant 0 : i32
    %c0_i32_1 = arith.constant 0 : i32
    %c0_i32_2 = arith.constant 0 : i32
    return %c0_i32, %c0_i32_0, %c0_i32_1 : i32, i32, i32
  }
  func.func @transform_4(%arg0: i32, %arg1: i32) -> (i32, i32, i32, i32) {
    %c0_i32 = arith.constant 0 : i32
    %c0_i32_0 = arith.constant 0 : i32
    %c0_i32_1 = arith.constant 0 : i32
    return %arg1, %c0_i32, %c0_i32_0, %arg0 : i32, i32, i32, i32
  }
}

</mosaic_0001>

<bundles_post_ra>
// kernel: tpu_custom_call.1
= control target key start
LH: loop header
LB: loop body
LE: loop exit
PB: predicated region body
PF: predicated region fallthrough
CT: control target
= control target key end

     0   :  { %9 = vsyncpa [#allocation3], 0  ;;  %s976_s0 = inlined_call_operand.hbm [shape: f32[2,3,8,256], index: 0, kind: input, shape index: {}]   ;;  %s977_s1 = inlined_call_operand.vmem [shape: f32[2,256], index: 1, kind: input, shape index: {}]   ;;  %s978_s2 = inlined_call_operand.vmem [shape: f32[3,8,1], index: 2, kind: input, shape index: {}]   ;;  %s979_s3 = inlined_call_operand.vmem [shape: f32[3,8,1], index: 3, kind: input, shape index: {}]   ;;  %s980_s4 = inlined_call_operand.hbm [shape: f32[2,3,8,256], index: 4, kind: output, shape index: {}]  }
   0x1   :  { %11 = vsyncpa [#allocation3 + $0x1], 0 }
   0x2   :  { %12 = vsyncpa [#allocation4], 0 }
   0x3   :  { %14 = vsyncpa [#allocation4 + $0x1], 0  ;;  %s778_s15 = smov 0   ;;  %s780_s16 = smov 0  }
   0x4   :  { %s782_s17 = smov 0   ;;  %s784_s18 = smov 0  }
   0x5   :  { %s786_s19 = smov 0   ;;  %s788_s20 = smov 0  }
   0x6 LB: > { %s529_s21 = sadd.s32 4294967295, %s744_s20   ;;  %s530_s22 = sadd.s32 4294967294, %s744_s20   ;;  %s744_s20 = sphi %s788_s20, %s20_s20   ;;  %s740_s19 = sphi %s786_s19, %s991_s19   ;;  %s736_s18 = sphi %s784_s18, %s990_s18   ;;  %s732_s17 = sphi %s782_s17, %s989_s17   ;;  %s728_s16 = sphi %s780_s16, %s988_s16   ;;  %s724_s15 = sphi %s778_s15, %s987_s15  }
   0x7   : > { %s29_s23 = sadd.s32 1, %s740_s19  ;;  %s41_s24 = sadd.s32 1, %s732_s17 }
   0x8   : > { %p30_p0 = scmp.ge.s32.totalorder %s29_s23, 2  ;;  %p48_p1 = scmp.ne.s32.totalorder %s732_s17, %s728_s16 }
   0x9   : > { %p49_p2 = scmp.eq.s32.totalorder %s744_s20, 0  ;;  %p54_p3 = scmp.ne.s32.totalorder %s728_s16, %s724_s15 }
   0xa   : > { %s993_s23 = smov (%p30_p0, %s29_s23), 0  ;;  %p55_p5 = scmp.eq.s32.totalorder %s529_s21, 0 }
   0xb   : > { %p819_p4 = por %p49_p2, %p48_p1  ;;  %s36_s26 = ssub.s32 %s740_s19, %s993_s23 }
   0xc   : > { %p148_p6 = scmp.eq.s32.totalorder %s529_s21, 1  ;;  %p39_p7 = scmp.eq.s32.totalorder %s36_s26, 0 }
   0xd   : > { %p825_p8 = por %p55_p5, %p54_p3  ;;  %p154_p10 = scmp.eq.s32.totalorder %s530_s22, 1 }
   0xe   : > { %p829_p9 = por %p148_p6, %p48_p1  ;;  %p555_p13 = scmp.lt.s32.totalorder %s744_s20, 2 }
   0xf   : > { %s834_s29 = scalar_select %p39_p7, %s732_s17, %s41_s24  }
  0x10   : > { %p836_p11 = por %p154_p10, %p54_p3  ;;  %s189_s5 = sand.u32 1, %s732_s17  }
  0x11   : > { %s539_s6 = smul.u32 48, %s189_s5  ;;  %p846_p0 = pnand %p555_p13, %p819_p4 }
  0x12   : > { %s540_s7 = smul.u32 768, %s740_s19  ;;  %p535_p1 = scmp.ge.s32.totalorder %s744_s20, 1 }
  0x13   : > { %s193_s12 = scalar_lea.vmem [#allocation2], %s539_s6  ;;  %s190_s14 = scalar_lea.sflag [#allocation3], %s189_s5 }
  0x14   : > { %s201_s11 = scalar_lea.hbm %s976_s0, %s540_s7  ;;  %s202_s13 = sshll.u32 %s193_s12, 4  ;;  %s203_s13 = int_to_ptr.vmem [resolvable:$true] %s202_s13 }
  0x15   : > { %p638_p2 = pneg %p846_p0  ;;  %s649_s21 = scalar_lea.vmem %s203_s13, 768 }
  0x16   : > { %p650_p3 = scmp.ne.s32.totalorder %s203_s13, %s649_s21  ;;  %s746_s22 = smov [#allocation2]  }
  0x17   : > { %s654_s24 = sshll.u32 %s746_s22, 4  ;;  %s655_s24 = int_to_ptr.vmem [resolvable:$false] %s654_s24 }
  0x18   : > { %p652_p5 = pnand %p650_p3, %p638_p2  ;;  %s656_s25 = scalar_lea.vmem %s655_s24, 1536 }
  0x19   : > { %p657_p4 = scmp.lt.s32.totalorder %s203_s13, %s655_s24  ;;  %p658_p7 = scmp.lt.s32.totalorder %s656_s25, %s649_s21 }
  0x1a   : > { %p653_p6 = pneg %p652_p5 }
  0x1b   : > { %p659_p10 = por %p658_p7, %p657_p4 }
  0x1d   : > { %p660_p13 = pnand %p659_p10, %p653_p6 }
  0x1f   : > { %663 = shalt.err (!%p660_p13)
}
  0x20   : > { %s747_s26 = smov 256   ;;  %s748_s5 = smov 16  }
  0x21   : > { %550 = dma.hbm_to_vmem [thread:$0]  (!%p846_p0), %s201_s11, 768, %s203_s13, %s190_s14, %s747_s26, %s747_s26, %s748_s5  }
  0x22   : > { %p210_p12 = scmp.lt.s32.totalorder %s744_s20, 3 }
  0x24   : > { %p211_p2 = pnand %p535_p1, %p210_p12 }
  0x25   : > { %s862_s6 = sand.u32 (!%p211_p2), 1, %s728_s16  }
  0x26   : > { %214 = sbr.rel (%p211_p2) target bundleno = 229 (0xe5), region = 36  ;;  %s217_s9 = scalar_lea.sflag (!%p211_p2), [#allocation3], %s862_s6 }
  0x27   : > { %s541_s7 = smul.u32 (!%p211_p2), 48, %s862_s6 }
  0x29   : > { %s220_s10 = scalar_lea.vmem (!%p211_p2), [#allocation2], %s541_s7 }
  0x2b   : > { %715 = dma.done.wait (%p825_p8), %s217_s9, 768  }
  0x2c   : > { %717 = vsyncadd (%p825_p8), %s217_s9, 4294966528  ;;  %v749_v0 = vmov 0   ;;  %v267_v1 = vld [vmem:[%s978_s2 + $0x10] sm:$0xff]  ;;  %v266_v2 = vld [vmem:[%s978_s2 + $0x8] sm:$0xff]  ;;  %v278_v33 = vlaneseq  ;;  %s249_s8 = scalar_lea.vmem [#allocation5], %s541_s7  ;;  %s542_s12 = smul.u32 768, %s736_s18 }
  0x2d   : > { %610 = vset.pattern.permute.xlu0 %v749_v0  ;;  %611 = vset.pattern.permute.xlu1 %v749_v0  ;;  %vm271_vm0 = vcmp.ne.f32.partialorder %v267_v1, 0.0  ;;  %v268_v4 = vld [vmem:[%s979_s3] sm:$0xff]  ;;  %v270_v6 = vld [vmem:[%s979_s3 + $0x10] sm:$0xff]  ;;  %v269_v7 = vld [vmem:[%s979_s3 + $0x8] sm:$0xff]  ;;  %s427_s11 = sshll.u32 %s249_s8, 4  ;;  %s412_s14 = scalar_lea.sflag [#allocation4], %s862_s6  ;;  %s919_s11 = int_to_ptr.vmem [resolvable:$true] %s427_s11 }
  0x2e   : > { %300 = vperm.xlu1 %611, %v266_v2   ;;  %v331_v3 = vsel %vm271_vm0, 1, %v749_v0  ;;  %v265_v5 = vld [vmem:[%s978_s2] sm:$0xff]  ;;  %v261_v9 = vld [vmem:[%s220_s10 + $0x18] sm:$0xff]  ;;  %v259_v11 = vld [vmem:[%s220_s10 + $0x8] sm:$0xff]  ;;  %v279_v34 = vshrl.u32 %v278_v33, 7  ;;  %s928_s13 = scalar_lea.hbm %s980_s4, %s542_s12  ;;  %s664_s21 = scalar_lea.vmem %s919_s11, 768 }
  0x2f   : > { %333 = vperm.xlu0 %610, %v331_v3   ;;  %v260_v8 = vld [vmem:[%s220_s10 + $0x10] sm:$0xff]  ;;  %v258_v10 = vld [vmem:[%s220_s10] sm:$0xff]  ;;  %v263_v13 = vld [vmem:[%s220_s10 + $0x28] sm:$0xff]  ;;  %v328_v15 = vsub.f32 0.0, %v261_v9  ;;  %v326_v17 = vsub.f32 0.0, %v259_v11  ;;  %p665_p8 = scmp.ne.s32.totalorder %s919_s11, %s664_s21  ;;  %s750_s27 = smov [#allocation5]  }
  0x30   : > { %v262_v12 = vld [vmem:[%s220_s10 + $0x20] sm:$0xff]  ;;  %v327_v14 = vsub.f32 0.0, %v260_v8  ;;  %v325_v16 = vsub.f32 0.0, %v258_v10  ;;  %v330_v20 = vsub.f32 0.0, %v263_v13  ;;  %v305_v35 = vsub.s32 1, %v279_v34  ;;  %s668_s22 = sshll.u32 %s750_s27, 4  ;;  %s669_s22 = int_to_ptr.vmem [resolvable:$false] %s668_s22 }
  0x31   : > { %v329_v18 = vsub.f32 0.0, %v262_v12  ;;  %v280_v36 = vsub.s32 0, %v279_v34  ;;  %v309_v38 = vsub.s32 3, %v279_v34  ;;  %v264_v39 = vld [vmem:[%s977_s1] sm:$0xf]  ;;  %v284_v40 = vsub.s32 2, %v279_v34  ;;  %p666_p12 = pnand %p665_p8, %p829_p9  ;;  %p671_p1 = scmp.lt.s32.totalorder %s919_s11, %s669_s22 }
  0x32   : > { %386 = vperm.xlu1 %611, %v268_v4   ;;  %v306_v46 = vrot.slane %v264_v39, %v305_v35  ;;  %s670_s24 = scalar_lea.vmem %s669_s22, 1536 }
  0x33   : > { %274 = vperm.xlu0 %610, %v265_v5   ;;  %v281_v47 = vrot.slane %v264_v39, %v280_v36  ;;  %v310_v50 = vrot.slane %v264_v39, %v309_v38  ;;  %v285_v51 = vrot.slane %v264_v39, %v284_v40  ;;  %p667_p0 = pneg %p666_p12  ;;  %p672_p3 = scmp.lt.s32.totalorder %s670_s24, %s664_s21 }
  0x34   : > { %v316_v56 = vrot.slane %v306_v46, %v305_v35 }
  0x35   : > { %v291_v57 = vrot.slane %v281_v47, %v280_v36  ;;  %v320_v59 = vrot.slane %v310_v50, %v305_v35  ;;  %v295_v61 = vrot.slane %v285_v51, %v280_v36  ;;  %p673_p5 = por %p672_p3, %p671_p1 }
  0x36   : > { %396 = vperm.xlu1 %611, %v270_v6  }
  0x37   : > { %391 = vperm.xlu0 %610, %v269_v7   ;;  %p674_p6 = pnand %p673_p5, %p667_p0 }
  0xa9   : > { %v301_v58 = vpop.permute.xlu1 %300 }
  0xaa   : > { %v890_v19 = vpop.permute.xlu0 %333  ;;  %v321_v62 = vmul.f32 %v316_v56, %v301_v58  ;;  %v322_v0 = vmul.f32 %v320_v59, %v301_v58 }
  0xab   : > { %vm335_vm1 = vcmp.eq.s32.totalorder %v890_v19, 1 }
  0xac   : > { %v338_v21 = vsel %vm335_vm1, %v260_v8, %v327_v14  ;;  %v339_v22 = vsel %vm335_vm1, %v261_v9, %v328_v15  ;;  %v336_v23 = vsel %vm335_vm1, %v258_v10, %v325_v16  ;;  %v337_v24 = vsel %vm335_vm1, %v259_v11, %v326_v17 }
  0xad   : > { %v346_v25 = vmul.f32 1.442695, %v338_v21  ;;  %v348_v26 = vmul.f32 1.442695, %v339_v22  ;;  %v342_v27 = vmul.f32 1.442695, %v336_v23  ;;  %v340_v28 = vsel %vm335_vm1, %v262_v12, %v329_v18  ;;  %v387_v7 = vpop.permute.xlu1 %386 }
  0xae   : > { %v344_v29 = vmul.f32 1.442695, %v337_v24  ;;  %v341_v30 = vsel %vm335_vm1, %v263_v13, %v330_v20  ;;  %v350_v31 = vmul.f32 1.442695, %v340_v28  ;;  %v275_v60 = vpop.permute.xlu0 %274 }
  0xaf   : > { %612 = vpow2.f32 %v346_v25  ;;  %v352_v32 = vmul.f32 1.442695, %v341_v30  ;;  %v296_v63 = vmul.f32 %v291_v57, %v275_v60  ;;  %v297_v1 = vmul.f32 %v295_v61, %v275_v60 }
  0xb0   : > { %614 = vpow2.f32 %v348_v26 }
  0xb1   : > { %616 = vpow2.f32 %v342_v27  ;;  %v323_v2 = vadd.f32 %v321_v62, %v296_v63  ;;  %v324_v4 = vadd.f32 %v322_v0, %v297_v1  ;;  %v397_v27 = vpop.permute.xlu1 %396 }
  0xb2   : > { %618 = vpow2.f32 %v344_v29  ;;  %v392_v11 = vpop.permute.xlu0 %391 }
  0xb3   : > { %620 = vpow2.f32 %v350_v31 }
  0xb4   : > { %622 = vpow2.f32 %v352_v32 }
  0xbc   : > { %v613_v37 = vpop.eup %612 }
  0xbd   : > { %v615_v41 = vpop.eup %614  ;;  %v356_v42 = vadd.f32 1.0, %v613_v37 }
  0xbe   : > { %v617_v43 = vpop.eup %616  ;;  %v357_v44 = vadd.f32 1.0, %v615_v41 }
  0xbf   : > { %v619_v45 = vpop.eup %618  ;;  %624 = vrcp.f32 %v356_v42  ;;  %v354_v48 = vadd.f32 1.0, %v617_v43 }
  0xc0   : > { %v621_v49 = vpop.eup %620  ;;  %626 = vrcp.f32 %v357_v44  ;;  %v355_v52 = vadd.f32 1.0, %v619_v45 }
  0xc1   : > { %v623_v53 = vpop.eup %622  ;;  %628 = vrcp.f32 %v354_v48  ;;  %v358_v54 = vadd.f32 1.0, %v621_v49 }
  0xc2   : > { %630 = vrcp.f32 %v355_v52  ;;  %v359_v55 = vadd.f32 1.0, %v623_v53 }
  0xc3   : > { %632 = vrcp.f32 %v358_v54 }
  0xc4   : > { %634 = vrcp.f32 %v359_v55 }
  0xcc   : > { %v625_v3 = vpop.eup %624 }
  0xcd   : > { %v627_v5 = vpop.eup %626  ;;  %v374_v6 = vadd.f32 %v625_v3, %v323_v2 }
  0xce   : > { %v629_v8 = vpop.eup %628  ;;  %v375_v9 = vadd.f32 %v627_v5, %v324_v4 }
  0xcf   : > { %v631_v10 = vpop.eup %630  ;;  %v380_v12 = vsel %vm335_vm1, %v613_v37, %v374_v6  ;;  %v372_v13 = vadd.f32 %v629_v8, %v323_v2 }
  0xd0   : > { %v633_v14 = vpop.eup %632  ;;  %v381_v15 = vsel %vm335_vm1, %v615_v41, %v375_v9  ;;  %v401_v16 = vmul.f32 %v392_v11, %v380_v12  ;;  %v373_v17 = vadd.f32 %v631_v10, %v324_v4 }
  0xd1   : > { %v635_v18 = vpop.eup %634  ;;  %v402_v20 = vmul.f32 %v392_v11, %v381_v15  ;;  %v378_v21 = vsel %vm335_vm1, %v617_v43, %v372_v13  ;;  %v376_v22 = vadd.f32 %v633_v14, %v323_v2 }
  0xd2   : > { %407 = vst [vmem:[%s249_s8 + $0x10] sm:$0xff] %v401_v16  ;;  %v379_v23 = vsel %vm335_vm1, %v619_v45, %v373_v17  ;;  %v399_v24 = vmul.f32 %v387_v7, %v378_v21  ;;  %v377_v25 = vadd.f32 %v635_v18, %v324_v4 }
  0xd3   : > { %408 = vst [vmem:[%s249_s8 + $0x18] sm:$0xff] %v402_v20  ;;  %v400_v26 = vmul.f32 %v387_v7, %v379_v23  ;;  %v382_v28 = vsel %vm335_vm1, %v621_v49, %v376_v22 }
  0xd4   : > { %405 = vst [vmem:[%s249_s8] sm:$0xff] %v399_v24  ;;  %v383_v29 = vsel %vm335_vm1, %v623_v53, %v377_v25  ;;  %v403_v30 = vmul.f32 %v397_v27, %v382_v28 }
  0xd5   : > { %406 = vst [vmem:[%s249_s8 + $0x8] sm:$0xff] %v400_v26  ;;  %v404_v31 = vmul.f32 %v397_v27, %v383_v29 }
  0xd6   : > { %409 = vst [vmem:[%s249_s8 + $0x20] sm:$0xff] %v403_v30 }
  0xd7   : > { %410 = vst [vmem:[%s249_s8 + $0x28] sm:$0xff] %v404_v31 }
  0xd8   : > { %677 = shalt.err (!%p674_p6)
}
  0xd9   : > { %s678_s25 = scalar_lea.hbm %s928_s13, 768  ;;  %s682_s9 = scalar_lea.hbm %s980_s4, 1536 }
  0xda   : > { %p679_p4 = scmp.ne.s32.totalorder %s928_s13, %s678_s25  ;;  %p683_p13 = scmp.lt.s32.totalorder %s928_s13, %s980_s4 }
  0xdb   : > { %p684_p2 = scmp.lt.s32.totalorder %s682_s9, %s678_s25 }
  0xdc   : > { %p680_p7 = pnand %p679_p4, %p829_p9 }
  0xdd   : > { %p685_p8 = por %p684_p2, %p683_p13 }
  0xde   : > { %p681_p10 = pneg %p680_p7 }
  0xe0   : > { %p686_p12 = pnand %p685_p8, %p681_p10 }
  0xe2   : > { %689 = shalt.err (!%p686_p12)
}
  0xe3   : > { %s751_s12 = smov 256   ;;  %s752_s18 = smov 16  }
  0xe4   : > { %545 = dma.vmem_to_hbm [thread:$0]  (%p829_p9), %s919_s11, 768, %s928_s13, %s412_s14, %s751_s12, %s751_s12, %s752_s18  }
  0xe5 PF: > { %s442_s7 = sand.u32 1, %s724_s15   ;;  %p986_p0 = scmp.ge.s32.totalorder %s744_s20, 2 }
  0xe6   : > { %s443_s21 = scalar_lea.sflag [#allocation4], %s442_s7 }
  0xe7   : > { %p552_p1 = pnand %p986_p0, %p836_p11 }
  0xe9   : > { %p553_p3 = pneg %p552_p1 }
  0xeb   : > { %719 = dma.done.wait (%p553_p3), %s443_s21, 768  }
  0xec   : > { %721 = vsyncadd (%p553_p3), %s443_s21, 4294966528  ;;  %s20_s20 = sadd.s32 1, %s744_s20   ;;  %s987_s15 = smov %s728_s16 }
  0xed   : > { %p17_p5 = scmp.ge.s32.totalorder %s20_s20, 4   ;;  %s988_s16 = smov %s732_s17 }
  0xee   : > { %s989_s17 = smov %s834_s29  ;;  %s990_s18 = smov %s740_s19 }
  0xef   : > { %s991_s19 = smov %s993_s23  ;;  %19 = sbr.rel (!%p17_p5) target bundleno = 6 (0x6), region = 84 }
  0xf4   :  { %448 = vsyncpa [#allocation3], 1 }
  0xf5   :  { %450 = vsyncpa [#allocation3 + $0x1], 1 }
  0xf6   :  { %451 = vsyncpa [#allocation4], 1 }
  0xf7   :  { %453 = vsyncpa [#allocation4 + $0x1], 1 }

</bundles_post_ra>
